<compile_context>
chip_gen: v7x
topology: tpu7x:2x2x1
jax: 0.10.0
libtpu: 0.0.40
codegen_flags: <defaults>
</compile_context>

<pallas_src>
import functools

import jax
import jax.numpy as jnp
from jax import lax
from jax.experimental import pallas as pl
from jax.experimental.pallas import tpu as pltpu


# ----------------------------- in-kernel helpers -----------------------------

def _conv_image(x_ref, t_ref, *, kh_size, oh_size, stride):
    """Whole-image conv output as (OH, OW*C_out) f32.

    x_ref: (1, H_pad, W_pad*C_in)      bf16  (folded, lane-dense image block)
    t_ref: (KH, W_pad*C_in, OW*C_out)  bf16  (block-Toeplitz folded weights)
    """
    acc = None
    for kh_i in range(kh_size):                 # static, fully unrolled (KH tiny)
        if stride == 1:
            lhs = x_ref[0, kh_i:kh_i + oh_size, :]            # (OH, W_pad*C_in)
        else:
            lhs = x_ref[0, pl.ds(kh_i, oh_size, stride), :]   # strided row pick
        part = jnp.dot(lhs, t_ref[kh_i], preferred_element_type=jnp.float32)
        acc = part if acc is None else acc + part
    return acc                                  # (OH, OW*C_out) f32


# ------------------------------- Pallas kernels -------------------------------

def _stats_kernel(x_ref, t_ref, stats_ref, *, kh_size, oh_size, stride):
    """Per-image partial BN stats (sum / sum-of-squares) in the folded layout."""
    y = _conv_image(x_ref, t_ref, kh_size=kh_size, oh_size=oh_size, stride=stride)
    stats_ref[0, 0:1, :] = jnp.sum(y, axis=0, keepdims=True)        # (1, OW*C_out)
    stats_ref[0, 1:2, :] = jnp.sum(y * y, axis=0, keepdims=True)


def _apply_kernel(x_ref, t_ref, ss_ref, o_ref, *, kh_size, oh_size, stride):
    """Recompute conv, apply fused BN scale/shift + LeakyReLU(0.1), store once."""
    y = _conv_image(x_ref, t_ref, kh_size=kh_size, oh_size=oh_size, stride=stride)
    scale = ss_ref[0:1, :]          # (1, OW*C_out) f32, pre-tiled wrapper-side
    shift = ss_ref[1:2, :]
    z = y * scale + shift           # single FMA over the whole image, f32
    o_ref[0, :, :] = jnp.where(z >= 0, z, jnp.float32(0.1) * z)


# -------------------------------- host wrapper --------------------------------

@functools.partial(jax.jit, static_argnames=("stride", "padding"))
def extraction_conv2d(x_nchw, conv_weight, gamma, beta, *, stride=1, padding=0):
    """Forward pass matching ExtractionConv2d (training-mode BatchNorm2d).

    x_nchw:      (N, C_in, H, W)         float32
    conv_weight: (C_out, C_in, KH, KW)   float32  (PyTorch OIHW layout, bias=False)
    gamma/beta:  (C_out,)                float32  (BatchNorm affine params)
    returns:     (N, C_out, OH, OW)      float32
    """
    c_out, c_in, kh, kw = conv_weight.shape
    n = x_nchw.shape[0]

    # NHWC + optional spatial padding, then fold channels into the lane dim.
    x_nhwc = jnp.transpose(x_nchw, (0, 2, 3, 1)).astype(jnp.float32)
    if padding > 0:
        x_nhwc = jnp.pad(
            x_nhwc, ((0, 0), (padding, padding), (padding, padding), (0, 0)))
    hp, wp = x_nhwc.shape[1], x_nhwc.shape[2]
    oh = (hp - kh) // stride + 1
    ow = (wp - kw) // stride + 1
    x_fold = x_nhwc.reshape(n, hp, wp * c_in).astype(jnp.bfloat16)   # lane-dense

    # Block-Toeplitz folded weights (wrapper-side, weight-only work):
    #   T[kh, w*C_in + c, ow*C_out + co] = W[co, c, kh, w - ow*stride]
    #   if 0 <= w - ow*stride < KW else 0.
    # The column stride is baked in here, so the kernel only slices contiguous rows.
    wt = jnp.transpose(conv_weight, (2, 3, 1, 0)).astype(jnp.float32)  # (KH,KW,Ci,Co)
    w_idx = jnp.arange(wp)
    ow_idx = jnp.arange(ow)
    kw_idx = w_idx[None, :] - ow_idx[:, None] * stride                 # (OW, WP)
    valid = (kw_idx >= 0) & (kw_idx < kw)
    kw_cl = jnp.clip(kw_idx, 0, kw - 1)
    t = wt[:, kw_cl]                                                   # (KH,OW,WP,Ci,Co)
    t = t * valid[None, :, :, None, None].astype(jnp.float32)
    t = jnp.transpose(t, (0, 2, 3, 1, 4)).reshape(kh, wp * c_in, ow * c_out)
    t = t.astype(jnp.bfloat16)

    grid = (n,)
    # Per-step working set (folded layout): x block + T + f32 output block ~ 100 KiB,
    # far below the scoped limit; raise only for very large images (after re-checking
    # the real tiled working set), per the review.
    cparams = pltpu.CompilerParams(
        dimension_semantics=("parallel",),
        vmem_limit_bytes=32 * 1024 * 1024,
    )
    static = dict(kh_size=kh, oh_size=oh, stride=stride)

    # --- Pass 1: per-image partial BN statistics (conv output never hits HBM) ---
    stats = pl.pallas_call(
        functools.partial(_stats_kernel, **static),
        out_shape=jax.ShapeDtypeStruct((n, 2, ow * c_out), jnp.float32),
        grid_spec=pltpu.PrefetchScalarGridSpec(
            num_scalar_prefetch=0,
            grid=grid,
            in_specs=[
                pl.BlockSpec((1, hp, wp * c_in), lambda i: (i, 0, 0)),
                pl.BlockSpec((kh, wp * c_in, ow * c_out), lambda i: (0, 0, 0)),
            ],
            out_specs=pl.BlockSpec((1, 2, ow * c_out), lambda i: (i, 0, 0)),
        ),
        compiler_params=cparams,
    )(x_fold, t)

    # --- Tiny host-side glue: reduce partials, build fused scale/shift ---
    count = jnp.float32(n * oh * ow)
    ssum = jnp.sum(stats.reshape(n, 2, ow, c_out), axis=(0, 2))        # (2, C_out)
    mean = ssum[0] / count
    var = jnp.maximum(ssum[1] / count - mean * mean, 0.0)              # clamp >= 0
    scale = gamma.astype(jnp.float32) * lax.rsqrt(var + jnp.float32(1e-6))
    shift = beta.astype(jnp.float32) - mean * scale
    # Pre-tile to the folded (OW*C_out) lane layout: the kernel epilogue then needs
    # no broadcast at all (review's "hoist the BN broadcast" item).
    scale_shift = jnp.stack([jnp.tile(scale, ow), jnp.tile(shift, ow)], axis=0)

    # --- Pass 2: recompute conv (cheap) + BN + LeakyReLU, single lane-dense write ---
    out_fold = pl.pallas_call(
        functools.partial(_apply_kernel, **static),
        out_shape=jax.ShapeDtypeStruct((n, oh, ow * c_out), jnp.float32),
        grid_spec=pltpu.PrefetchScalarGridSpec(
            num_scalar_prefetch=0,
            grid=grid,
            in_specs=[
                pl.BlockSpec((1, hp, wp * c_in), lambda i: (i, 0, 0)),
                pl.BlockSpec((kh, wp * c_in, ow * c_out), lambda i: (0, 0, 0)),
                pl.BlockSpec((2, ow * c_out), lambda i: (0, 0)),
            ],
            out_specs=pl.BlockSpec((1, oh, ow * c_out), lambda i: (i, 0, 0)),
        ),
        compiler_params=cparams,
    )(x_fold, t, scale_shift)

    # Un-fold + NHWC -> NCHW left to XLA (reshape is free; the transpose would only
    # reintroduce masked stores if fused into the kernel).
    out_nhwc = out_fold.reshape(n, oh, ow, c_out)
    return jnp.transpose(out_nhwc, (0, 3, 1, 2))


# ------------------------------ reference (JAX) -------------------------------

def _reference(x_nchw, conv_weight, gamma, beta, stride, padding):
    y = lax.conv_general_dilated(
        x_nchw, conv_weight, window_strides=(stride, stride),
        padding=[(padding, padding), (padding, padding)],
        dimension_numbers=("NCHW", "OIHW", "NCHW"))
    mean = jnp.mean(y, axis=(0, 2, 3), keepdims=True)
    var = jnp.mean((y - mean) ** 2, axis=(0, 2, 3), keepdims=True)
    z = (y - mean) * lax.rsqrt(var + 1e-6)
    z = z * gamma.reshape(1, -1, 1, 1) + beta.reshape(1, -1, 1, 1)
    return jnp.where(z >= 0, z, 0.1 * z)


# ------------------------------------ main -------------------------------------

if __name__ == "__main__":
    key = jax.random.PRNGKey(0)
    k_x, k_w, k_g, k_b = jax.random.split(key, 4)

    # Module config: ExtractionConv2d(in_channels=4, out_channels=8, kernel_size=3)
    N, C_in, H, W = 2, 4, 16, 16
    C_out, KH, KW = 8, 3, 3
    stride, padding = 1, 0

    x = jax.random.normal(k_x, (N, C_in, H, W), dtype=jnp.float32)
    conv_w = jax.random.normal(k_w, (C_out, C_in, KH, KW), dtype=jnp.float32) * 0.1
    gamma = 1.0 + 0.1 * jax.random.normal(k_g, (C_out,), dtype=jnp.float32)
    beta = 0.1 * jax.random.normal(k_b, (C_out,), dtype=jnp.float32)

    out = extraction_conv2d(x, conv_w, gamma, beta, stride=stride, padding=padding)
    out = jax.block_until_ready(out)

    ref = _reference(x, conv_w, gamma, beta, stride, padding)
    assert out.shape == ref.shape, (out.shape, ref.shape)
    # Tolerance accounts for bf16 MXU operands (f32 accumulation + f32 BN epilogue).
    assert jnp.allclose(out, ref, rtol=2e-2, atol=2e-2), float(
        jnp.max(jnp.abs(out - ref)))

    print("KERNEL_OK")
</pallas_src>

<mosaic_0001>
module attributes {stable_mosaic.version = 11 : i64} {
  func.func @_stats_kernel(%arg0: i32, %arg1: memref<1x16x64xbf16, #tpu.memory_space<vmem>>, %arg2: memref<3x64x112xbf16, #tpu.memory_space<vmem>>, %arg3: memref<1x2x112xf32, #tpu.memory_space<vmem>>) attributes {dimension_semantics = [#tpu.dimension_semantics<parallel>], iteration_bounds = array<i64: 2>, scalar_prefetch = 0 : i64, scratch_operands = 0 : i64, tpu.core_type = #tpu.core_type<tc>, window_params = [{transform_indices = @transform_0, window_bounds = array<i64: 1, 16, 64>}, {pipeline_mode = #tpu.pipeline_mode<synchronous>, transform_indices = @transform_1, window_bounds = array<i64: 3, 64, 112>}, {transform_indices = @transform_2, window_bounds = array<i64: 1, 2, 112>}]} {
    %c0 = arith.constant 0 : index
    %c0_0 = arith.constant 0 : index
    %c0_1 = arith.constant 0 : index
    %0 = vector.load %arg1[%c0, %c0_0, %c0_1] : memref<1x16x64xbf16, #tpu.memory_space<vmem>>, vector<1x14x64xbf16>
    %1 = vector.shape_cast %0 : vector<1x14x64xbf16> to vector<14x64xbf16>
    %c0_2 = arith.constant 0 : index
    %c0_3 = arith.constant 0 : index
    %c0_4 = arith.constant 0 : index
    %2 = vector.load %arg2[%c0_2, %c0_3, %c0_4] : memref<3x64x112xbf16, #tpu.memory_space<vmem>>, vector<1x64x112xbf16>
    %3 = vector.shape_cast %2 : vector<1x64x112xbf16> to vector<64x112xbf16>
    %cst = arith.constant dense<0.000000e+00> : vector<14x112xf32>
    %4 = tpu.matmul %1, %3, %cst {dimension_numbers = #tpu.dot_dimension_numbers<[1], [0], [0], [1], [0, 0, 1, 1], [], []>} : vector<14x64xbf16>, vector<64x112xbf16>, vector<14x112xf32> -> vector<14x112xf32>
    %c0_5 = arith.constant 0 : index
    %c1 = arith.constant 1 : index
    %c0_6 = arith.constant 0 : index
    %5 = vector.load %arg1[%c0_5, %c1, %c0_6] : memref<1x16x64xbf16, #tpu.memory_space<vmem>>, vector<1x14x64xbf16>
    %6 = vector.shape_cast %5 : vector<1x14x64xbf16> to vector<14x64xbf16>
    %c1_7 = arith.constant 1 : index
    %c0_8 = arith.constant 0 : index
    %c0_9 = arith.constant 0 : index
    %7 = vector.load %arg2[%c1_7, %c0_8, %c0_9] : memref<3x64x112xbf16, #tpu.memory_space<vmem>>, vector<1x64x112xbf16>
    %8 = vector.shape_cast %7 : vector<1x64x112xbf16> to vector<64x112xbf16>
    %cst_10 = arith.constant dense<0.000000e+00> : vector<14x112xf32>
    %9 = tpu.matmul %6, %8, %cst_10 {dimension_numbers = #tpu.dot_dimension_numbers<[1], [0], [0], [1], [0, 0, 1, 1], [], []>} : vector<14x64xbf16>, vector<64x112xbf16>, vector<14x112xf32> -> vector<14x112xf32>
    %10 = arith.addf %4, %9 : vector<14x112xf32>
    %c0_11 = arith.constant 0 : index
    %c2 = arith.constant 2 : index
    %c0_12 = arith.constant 0 : index
    %11 = vector.load %arg1[%c0_11, %c2, %c0_12] : memref<1x16x64xbf16, #tpu.memory_space<vmem>>, vector<1x14x64xbf16>
    %12 = vector.shape_cast %11 : vector<1x14x64xbf16> to vector<14x64xbf16>
    %c2_13 = arith.constant 2 : index
    %c0_14 = arith.constant 0 : index
    %c0_15 = arith.constant 0 : index
    %13 = vector.load %arg2[%c2_13, %c0_14, %c0_15] : memref<3x64x112xbf16, #tpu.memory_space<vmem>>, vector<1x64x112xbf16>
    %14 = vector.shape_cast %13 : vector<1x64x112xbf16> to vector<64x112xbf16>
    %cst_16 = arith.constant dense<0.000000e+00> : vector<14x112xf32>
    %15 = tpu.matmul %12, %14, %cst_16 {dimension_numbers = #tpu.dot_dimension_numbers<[1], [0], [0], [1], [0, 0, 1, 1], [], []>} : vector<14x64xbf16>, vector<64x112xbf16>, vector<14x112xf32> -> vector<14x112xf32>
    %16 = arith.addf %10, %15 : vector<14x112xf32>
    %cst_17 = arith.constant dense<0.000000e+00> : vector<112xf32>
    %17 = vector.multi_reduction <add>, %16, %cst_17 [0] : vector<14x112xf32> to vector<112xf32>
    %18 = vector.shape_cast %17 : vector<112xf32> to vector<1x112xf32>
    %c0_18 = arith.constant 0 : index
    %c0_19 = arith.constant 0 : index
    %c0_20 = arith.constant 0 : index
    %19 = vector.load %arg3[%c0_18, %c0_19, %c0_20] : memref<1x2x112xf32, #tpu.memory_space<vmem>>, vector<1x1x112xf32>
    %20 = vector.shape_cast %19 : vector<1x1x112xf32> to vector<1x112xf32>
    %21 = vector.shape_cast %18 : vector<1x112xf32> to vector<1x1x112xf32>
    tpu.vector_store %arg3[%c0_18, %c0_19, %c0_20], %21 {strides = array<i32>} : memref<1x2x112xf32, #tpu.memory_space<vmem>>, vector<1x1x112xf32>,
    %22 = arith.mulf %16, %16 : vector<14x112xf32>
    %cst_21 = arith.constant dense<0.000000e+00> : vector<112xf32>
    %23 = vector.multi_reduction <add>, %22, %cst_21 [0] : vector<14x112xf32> to vector<112xf32>
    %24 = vector.shape_cast %23 : vector<112xf32> to vector<1x112xf32>
    %c0_22 = arith.constant 0 : index
    %c1_23 = arith.constant 1 : index
    %c0_24 = arith.constant 0 : index
    %25 = vector.load %arg3[%c0_22, %c1_23, %c0_24] : memref<1x2x112xf32, #tpu.memory_space<vmem>>, vector<1x1x112xf32>
    %26 = vector.shape_cast %25 : vector<1x1x112xf32> to vector<1x112xf32>
    %27 = vector.shape_cast %24 : vector<1x112xf32> to vector<1x1x112xf32>
    tpu.vector_store %arg3[%c0_22, %c1_23, %c0_24], %27 {strides = array<i32>} : memref<1x2x112xf32, #tpu.memory_space<vmem>>, vector<1x1x112xf32>,
    return
  }
  func.func @transform_0(%arg0: i32) -> (i32, i32, i32) {
    %c0_i32 = arith.constant 0 : i32
    %c0_i32_0 = arith.constant 0 : i32
    %c0_i32_1 = arith.constant 0 : i32
    return %arg0, %c0_i32, %c0_i32_0 : i32, i32, i32
  }
  func.func @transform_1(%arg0: i32) -> (i32, i32, i32) {
    %c0_i32 = arith.constant 0 : i32
    %c0_i32_0 = arith.constant 0 : i32
    %c0_i32_1 = arith.constant 0 : i32
    %c0_i32_2 = arith.constant 0 : i32
    return %c0_i32, %c0_i32_0, %c0_i32_1 : i32, i32, i32
  }
  func.func @transform_2(%arg0: i32) -> (i32, i32, i32) {
    %c0_i32 = arith.constant 0 : i32
    %c0_i32_0 = arith.constant 0 : i32
    %c0_i32_1 = arith.constant 0 : i32
    return %arg0, %c0_i32, %c0_i32_0 : i32, i32, i32
  }
}

module attributes {stable_mosaic.version = 11 : i64} {
  func.func @_apply_kernel(%arg0: i32, %arg1: memref<1x16x64xbf16, #tpu.memory_space<vmem>>, %arg2: memref<3x64x112xbf16, #tpu.memory_space<vmem>>, %arg3: memref<2x112xf32, #tpu.memory_space<vmem>>, %arg4: memref<1x14x112xf32, #tpu.memory_space<vmem>>) attributes {dimension_semantics = [#tpu.dimension_semantics<parallel>], iteration_bounds = array<i64: 2>, scalar_prefetch = 0 : i64, scratch_operands = 0 : i64, tpu.core_type = #tpu.core_type<tc>, window_params = [{transform_indices = @transform_0, window_bounds = array<i64: 1, 16, 64>}, {pipeline_mode = #tpu.pipeline_mode<synchronous>, transform_indices = @transform_1, window_bounds = array<i64: 3, 64, 112>}, {pipeline_mode = #tpu.pipeline_mode<synchronous>, transform_indices = @transform_2, window_bounds = array<i64: 2, 112>}, {transform_indices = @transform_3, window_bounds = array<i64: 1, 14, 112>}]} {
    %c0 = arith.constant 0 : index
    %c0_0 = arith.constant 0 : index
    %c0_1 = arith.constant 0 : index
    %0 = vector.load %arg1[%c0, %c0_0, %c0_1] : memref<1x16x64xbf16, #tpu.memory_space<vmem>>, vector<1x14x64xbf16>
    %1 = vector.shape_cast %0 : vector<1x14x64xbf16> to vector<14x64xbf16>
    %c0_2 = arith.constant 0 : index
    %c0_3 = arith.constant 0 : index
    %c0_4 = arith.constant 0 : index
    %2 = vector.load %arg2[%c0_2, %c0_3, %c0_4] : memref<3x64x112xbf16, #tpu.memory_space<vmem>>, vector<1x64x112xbf16>
    %3 = vector.shape_cast %2 : vector<1x64x112xbf16> to vector<64x112xbf16>
    %cst = arith.constant dense<0.000000e+00> : vector<14x112xf32>
    %4 = tpu.matmul %1, %3, %cst {dimension_numbers = #tpu.dot_dimension_numbers<[1], [0], [0], [1], [0, 0, 1, 1], [], []>} : vector<14x64xbf16>, vector<64x112xbf16>, vector<14x112xf32> -> vector<14x112xf32>
    %c0_5 = arith.constant 0 : index
    %c1 = arith.constant 1 : index
    %c0_6 = arith.constant 0 : index
    %5 = vector.load %arg1[%c0_5, %c1, %c0_6] : memref<1x16x64xbf16, #tpu.memory_space<vmem>>, vector<1x14x64xbf16>
    %6 = vector.shape_cast %5 : vector<1x14x64xbf16> to vector<14x64xbf16>
    %c1_7 = arith.constant 1 : index
    %c0_8 = arith.constant 0 : index
    %c0_9 = arith.constant 0 : index
    %7 = vector.load %arg2[%c1_7, %c0_8, %c0_9] : memref<3x64x112xbf16, #tpu.memory_space<vmem>>, vector<1x64x112xbf16>
    %8 = vector.shape_cast %7 : vector<1x64x112xbf16> to vector<64x112xbf16>
    %cst_10 = arith.constant dense<0.000000e+00> : vector<14x112xf32>
    %9 = tpu.matmul %6, %8, %cst_10 {dimension_numbers = #tpu.dot_dimension_numbers<[1], [0], [0], [1], [0, 0, 1, 1], [], []>} : vector<14x64xbf16>, vector<64x112xbf16>, vector<14x112xf32> -> vector<14x112xf32>
    %10 = arith.addf %4, %9 : vector<14x112xf32>
    %c0_11 = arith.constant 0 : index
    %c2 = arith.constant 2 : index
    %c0_12 = arith.constant 0 : index
    %11 = vector.load %arg1[%c0_11, %c2, %c0_12] : memref<1x16x64xbf16, #tpu.memory_space<vmem>>, vector<1x14x64xbf16>
    %12 = vector.shape_cast %11 : vector<1x14x64xbf16> to vector<14x64xbf16>
    %c2_13 = arith.constant 2 : index
    %c0_14 = arith.constant 0 : index
    %c0_15 = arith.constant 0 : index
    %13 = vector.load %arg2[%c2_13, %c0_14, %c0_15] : memref<3x64x112xbf16, #tpu.memory_space<vmem>>, vector<1x64x112xbf16>
    %14 = vector.shape_cast %13 : vector<1x64x112xbf16> to vector<64x112xbf16>
    %cst_16 = arith.constant dense<0.000000e+00> : vector<14x112xf32>
    %15 = tpu.matmul %12, %14, %cst_16 {dimension_numbers = #tpu.dot_dimension_numbers<[1], [0], [0], [1], [0, 0, 1, 1], [], []>} : vector<14x64xbf16>, vector<64x112xbf16>, vector<14x112xf32> -> vector<14x112xf32>
    %16 = arith.addf %10, %15 : vector<14x112xf32>
    %c0_17 = arith.constant 0 : index
    %c0_18 = arith.constant 0 : index
    %17 = vector.load %arg3[%c0_17, %c0_18] : memref<2x112xf32, #tpu.memory_space<vmem>>, vector<1x112xf32>
    %c1_19 = arith.constant 1 : index
    %c0_20 = arith.constant 0 : index
    %18 = vector.load %arg3[%c1_19, %c0_20] : memref<2x112xf32, #tpu.memory_space<vmem>>, vector<1x112xf32>
    %19 = vector.broadcast %17 : vector<1x112xf32> to vector<14x112xf32>
    %20 = arith.mulf %16, %19 : vector<14x112xf32>
    %21 = vector.broadcast %18 : vector<1x112xf32> to vector<14x112xf32>
    %22 = arith.addf %20, %21 : vector<14x112xf32>
    %cst_21 = arith.constant 0.000000e+00 : f32
    %23 = vector.broadcast %cst_21 : f32 to vector<14x112xf32>
    %24 = arith.cmpf oge, %22, %23 : vector<14x112xf32>
    %cst_22 = arith.constant 1.000000e-01 : f32
    %25 = vector.broadcast %cst_22 : f32 to vector<14x112xf32>
    %26 = arith.mulf %25, %22 : vector<14x112xf32>
    %27 = arith.select %24, %22, %26 : vector<14x112xi1>, vector<14x112xf32>
    %c0_23 = arith.constant 0 : index
    %c0_24 = arith.constant 0 : index
    %c0_25 = arith.constant 0 : index
    %28 = vector.load %arg4[%c0_23, %c0_24, %c0_25] : memref<1x14x112xf32, #tpu.memory_space<vmem>>, vector<1x14x112xf32>
    %29 = vector.shape_cast %28 : vector<1x14x112xf32> to vector<14x112xf32>
    %30 = vector.shape_cast %27 : vector<14x112xf32> to vector<1x14x112xf32>
    tpu.vector_store %arg4[%c0_23, %c0_24, %c0_25], %30 {strides = array<i32>} : memref<1x14x112xf32, #tpu.memory_space<vmem>>, vector<1x14x112xf32>,
    return
  }
  func.func @transform_0(%arg0: i32) -> (i32, i32, i32) {
    %c0_i32 = arith.constant 0 : i32
    %c0_i32_0 = arith.constant 0 : i32
    %c0_i32_1 = arith.constant 0 : i32
    return %arg0, %c0_i32, %c0_i32_0 : i32, i32, i32
  }
  func.func @transform_1(%arg0: i32) -> (i32, i32, i32) {
    %c0_i32 = arith.constant 0 : i32
    %c0_i32_0 = arith.constant 0 : i32
    %c0_i32_1 = arith.constant 0 : i32
    %c0_i32_2 = arith.constant 0 : i32
    return %c0_i32, %c0_i32_0, %c0_i32_1 : i32, i32, i32
  }
  func.func @transform_2(%arg0: i32) -> (i32, i32) {
    %c0_i32 = arith.constant 0 : i32
    %c0_i32_0 = arith.constant 0 : i32
    %c0_i32_1 = arith.constant 0 : i32
    return %c0_i32, %c0_i32_0 : i32, i32
  }
  func.func @transform_3(%arg0: i32) -> (i32, i32, i32) {
    %c0_i32 = arith.constant 0 : i32
    %c0_i32_0 = arith.constant 0 : i32
    %c0_i32_1 = arith.constant 0 : i32
    return %arg0, %c0_i32, %c0_i32_0 : i32, i32, i32
  }
}

</mosaic_0001>

<bundles_post_ra>
// kernel: extraction_conv2d.2
= control target key start
LH: loop header
LB: loop body
LE: loop exit
PB: predicated region body
PF: predicated region fallthrough
CT: control target
= control target key end

     0   :  { %s629_s9 = smov 0   ;;  %s692_s0 = inlined_call_operand.vmem [shape: bf16[2,16,64], index: 0, kind: input, shape index: {}]   ;;  %s693_s1 = inlined_call_operand.vmem [shape: bf16[3,64,112], index: 1, kind: input, shape index: {}]   ;;  %s694_s2 = inlined_call_operand.vmem [shape: f32[2,2,112], index: 2, kind: output, shape index: {}]  }
   0x1 LB: > { %s477_s10 = sadd.s32 4294967295, %s610_s9   ;;  %p481_p0 = scmp.ge.s32.totalorder %s610_s9, 1  ;;  %s610_s9 = sphi %s629_s9, %s12_s9  }
   0x2   : > { %p112_p1 = scmp.lt.s32.totalorder %s610_s9, 3 }
   0x4   : > { %p113_p2 = pnand %p481_p0, %p112_p1 }
   0x5   : > { %v589_v0 = vld [vmem:[%s693_s1] sm:$0xff] (!%p113_p2)   ;;  %v612_v1 = vmov (!%p113_p2), 0.0   ;;  %v590_v2 = vld [vmem:[%s693_s1 + $0x8] sm:$0xff] (!%p113_p2)   ;;  %vm613_vm0 = vmmov (!%p113_p2), 0   ;;  %p133_p3 = scmp.lt.s32.totalorder (!%p113_p2), %s477_s10, 1  ;;  %v591_v4 = vld [vmem:[%s693_s1 + $0x10] sm:$0xff] (!%p113_p2)  }
   0x6   : > { %116 = sbr.rel (%p113_p2) target bundleno = 272 (0x110), region = 28  ;;  %549 = vmatprep.subr.bf16.mxu0 (!%p113_p2), %v612_v1  ;;  %537 = vmatprep.subr.bf16.mxu1 (!%p113_p2), %v612_v1  ;;  %v593_v3 = vld [vmem:[%s693_s1 + $0x20] sm:$0xff] (!%p113_p2)   ;;  %v598_v5 = vld [vmem:[%s693_s1 + $0x28] sm:$0xff] (!%p113_p2)   ;;  %v592_v6 = vld [vmem:[%s693_s1 + $0x18] sm:$0xff] (!%p113_p2)   ;;  %vm199_vm1 = vcmask (!%p113_p2), 523264   ;;  %vm399_vm2 = vcmask (!%p113_p2), 916480  }
   0x7   : > { %550 = vmatpush3.bf16.msra.mxu0 (!%p113_p2), %v589_v0  ;;  %557 = vmatprep.mubr.msk.bf16.mxu0 (!%p113_p2), %vm613_vm0, %v612_v1  ;;  %v600_v11 = vld [vmem:[%s693_s1 + $0x30] sm:$0xff] (!%p113_p2)   ;;  %v597_v15 = vld [vmem:[%s693_s1 + $0x40] sm:$0xff] (!%p113_p2)   ;;  %v602_v16 = vld [vmem:[%s693_s1 + $0x38] sm:$0xff] (!%p113_p2)   ;;  %vm401_vm3 = vcmask (!%p113_p2), 914432   ;;  %vm410_vm4 = vcmask (!%p113_p2), 909312  }
   0x8   : > { %551 = vmatprep.subr.bf16.mxu0 (!%p113_p2), %v612_v1  ;;  %545 = vmatprep.mubr.msk.bf16.mxu1 (!%p113_p2), %vm613_vm0, %v612_v1  ;;  %v599_v19 = vld [vmem:[%s693_s1 + $0x48] sm:$0xff] (!%p113_p2)   ;;  %v601_v21 = vld [vmem:[%s693_s1 + $0x50] sm:$0xff] (!%p113_p2)   ;;  %v603_v23 = vld [vmem:[%s693_s1 + $0x58] sm:$0xff] (!%p113_p2)  }
   0x9   : > { %538 = vmatpush3.bf16.msra.mxu1 (!%p113_p2), %v593_v3 }
   0xa   : > { %539 = vmatprep.subr.bf16.mxu1 (!%p113_p2), %v612_v1 }
   0xb   : > { %552 = vmatpush3.bf16.msra.mxu0 (!%p113_p2), %v590_v2 }
   0xc   : > { %553 = vmatprep.subr.bf16.mxu0 (!%p113_p2), %v612_v1 }
   0xd   : > { %s696_s10 = smov (!%p133_p3, %s477_s10), 1  ;;  %540 = vmatpush3.bf16.msra.mxu1 %v598_v5 }
   0xe   : > { %s521_s19 = sshll.u32 %s696_s10, 3  ;;  %541 = vmatprep.subr.bf16.mxu1 %v612_v1  ;;  %s484_s13 = sshll.u32 %s696_s10, 1 }
   0xf   : > { %s137_s24 = scalar_lea.vmem %s692_s0, %s521_s19  ;;  %554 = vmatpush3.bf16.msra.mxu0 %v591_v4  ;;  %s141_s16 = scalar_lea.vmem %s694_s2, %s484_s13 }
  0x10   : > { %v143_v7 = vld [vmem:[%s137_s24] sm:$0xf]  ;;  %v153_v8 = vld [vmem:[%s137_s24 + $0x4] sm:$0xf]  ;;  %555 = vmatprep.subr.bf16.mxu0 %v612_v1 }
  0x11   : > { %v144_v9 = vld [vmem:[%s137_s24 + $0x4] sm:$0x7]  ;;  %v493_v10 = vcombine.low %v143_v7, %v153_v8  ;;  %542 = vmatpush3.bf16.msra.mxu1 %v600_v11  ;;  %v315_v20 = vld [vmem:[%s137_s24] sm:$0xe] }
  0x12   : > { %v499_v13 = vcombine.low %v143_v7, %v144_v9  ;;  %543 = vmatprep.subr.bf16.mxu1 %v612_v1  ;;  %v513_v22 = vcombine.low %v315_v20, %v153_v8 }
  0x13   : > { %v171_v12 = vshll.u32 %v493_v10, 16  ;;  %v169_v14 = vshrl.u32 %v493_v10, 16  ;;  %556 = vmatpush3.bf16.msra.mxu0 %v592_v6 }
  0x14   : > { %561 = vmatprep.subr.bf16.mxu0 %v612_v1  ;;  %v328_v24 = vrot.slane %v513_v22, 1 }
  0x15   : > { %v173_v17 = vrot.slane %v171_v12, 1  ;;  %544 = vmatpush3.bf16.msra.mxu1 %v602_v16 }
  0x16   : > { %558 = vmatmul.mubr.msk.bf16.vlgmr.msra.gmra.mrb[0].mxu0 %vm199_vm1, %v499_v13 }
  0x17   : > { %v174_v18 = vor.u32 %v173_v17, %v169_v14  ;;  %562 = vmatpush3.bf16.msra.mxu0 %v597_v15  ;;  %569 = vmatprep.mubr.msk.bf16.mxu0 %vm613_vm0, %v612_v1 }
  0x18   : > { %563 = vmatprep.subr.bf16.mxu0 %v612_v1 }
  0x19   : > { %546 = vmatmul.mubr.msk.bf16.vlgmr.msra.gmra.mrb[0].mxu1 %vm199_vm1, %v174_v18 }
  0x1b   : > { %564 = vmatpush3.bf16.msra.mxu0 %v599_v19 }
  0x1c   : > { %565 = vmatprep.subr.bf16.mxu0 %v612_v1 }
  0x1f   : > { %566 = vmatpush3.bf16.msra.mxu0 %v601_v21 }
  0x20   : > { %567 = vmatprep.subr.bf16.mxu0 %v612_v1 }
  0x23   : > { %568 = vmatpush3.bf16.msra.mxu0 %v603_v23 }
  0x26   : > { %570 = vmatmul.mubr.msk.bf16.vlgmr.msra.gmra.mrb[0].mxu0 %vm199_vm1, %v328_v24 }
  0xec   : > { %v237_v25 = vpop.f32.mrb[0].mxu1 }
  0xed   : > { %v547_v26 = vpop.f32.mrb[1].mxu1 }
  0xee   : > { %v240_v27 = vpop.f32.mrb[2].mxu1 }
  0xef   : > { %v548_v28 = vpop.f32.mrb[3].mxu1 }
  0xf9   : > { %v390_v29 = vpop.f32.mrb[0].mxu0 }
  0xfa   : > { %v573_v30 = vadd.f32 %v390_v29, %v237_v25  ;;  %v571_v31 = vpop.f32.mrb[1].mxu0 }
  0xfb   : > { %v393_v32 = vpop.f32.mrb[2].mxu0 }
  0xfc   : > { %v412_v33 = vmul.f32 %v573_v30, %v573_v30  ;;  %v574_v34 = vadd.f32 %v393_v32, %v240_v27  ;;  %v572_v35 = vpop.f32.mrb[3].mxu0  ;;  %v400_v36 = vsel %vm399_vm2, %v573_v30, 0.0 }
  0xfe   : > { %v402_v37 = vsel %vm401_vm3, %v574_v34, 0.0  ;;  %v413_v38 = vmul.f32 %v574_v34, %v574_v34  ;;  %v414_v40 = vsel %vm399_vm2, %v412_v33, 0.0 }
  0xff   : > { %v403_v39 = vadd.f32 %v402_v37, %v400_v36 }
 0x100   : > { %v415_v41 = vsel %vm401_vm3, %v413_v38, 0.0 }
 0x101   : > { %v404_v42 = vrot.slane %v403_v39, 4  ;;  %v416_v43 = vadd.f32 %v415_v41, %v414_v40 }
 0x103   : > { %v405_v44 = vadd.f32 %v404_v42, %v403_v39  ;;  %v417_v45 = vrot.slane %v416_v43, 4 }
 0x105   : > { %v406_v46 = vrot.slane %v405_v44, 2  ;;  %v418_v47 = vadd.f32 %v417_v45, %v416_v43 }
 0x107   : > { %v407_v48 = vadd.f32 %v406_v46, %v405_v44  ;;  %v419_v49 = vrot.slane %v418_v47, 2 }
 0x109   : > { %v408_v50 = vrot.slane %v407_v48, 1  ;;  %v420_v51 = vadd.f32 %v419_v49, %v418_v47 }
 0x10b   : > { %v409_v52 = vadd.f32 %v408_v50, %v407_v48  ;;  %v421_v53 = vrot.slane %v420_v51, 1 }
 0x10d   : > { %411 = vst.msk [vmem:[%s141_s16] sm:$0x1] %vm410_vm4, %v409_v52  ;;  %v422_v54 = vadd.f32 %v421_v53, %v420_v51 }
 0x10f   : > { %423 = vst.msk [vmem:[%s141_s16 + $0x1] sm:$0x1] %vm410_vm4, %v422_v54 }
 0x110 PF: > { %s12_s9 = sadd.s32 1, %s610_s9  }
 0x111   : > { %p9_p4 = scmp.ge.s32.totalorder %s12_s9, 4  }
 0x113   :  { %11 = sbr.rel (!%p9_p4) target bundleno = 1 (0x1), region = 60 }

// kernel: tile.13
= control target key start
LH: loop header
LB: loop body
LE: loop exit
PB: predicated region body
PF: predicated region fallthrough
CT: control target
= control target key end

     0   :  { %s28_s0 = inlined_call_operand.vmem [shape: f32[8], index: 0, kind: input, shape index: {}]   ;;  %s29_s1 = inlined_call_operand.vmem [shape: f32[14,8], index: 1, kind: output, shape index: {}]  }
   0x1   :  { %v4_v0 = vld [vmem:[%s28_s0] ss:$0 sm:$0xff] }
   0x2   :  { %5 = vst [vmem:[%s29_s1] sm:$0xff] %v4_v0  ;;  %8 = vst [vmem:[%s29_s1 + $0x8] sm:$0xff] %v4_v0 }

// kernel: tile.18
= control target key start
LH: loop header
LB: loop body
LE: loop exit
PB: predicated region body
PF: predicated region fallthrough
CT: control target
= control target key end

     0   :  { %s115_s10 = smov 104   ;;  %s116_s11 = smov 88   ;;  %vm3_vm0 = vcmask 64512   ;;  %vm9_vm1 = vcmask 917312   ;;  %vm15_vm2 = vcmask 851712   ;;  %vm21_vm3 = vcmask 786112   ;;  %s183_s0 = inlined_call_operand.vmem [shape: f32[14,8], index: 0, kind: input, shape index: {}]   ;;  %s184_s1 = inlined_call_operand.vmem [shape: f32[1,112], index: 1, kind: output, shape index: {}]  }
   0x1   :  { %v89_v0 = vld [vmem:[%s183_s0 + $0xd] sm:$0x1]   ;;  %v91_v1 = vld [vmem:[%s183_s0 + $0xb] sm:$0x1]   ;;  %v90_v2 = vld [vmem:[%s183_s0 + $0xc] sm:$0x1]  }
   0x2   :  { %7 = vrot.lane.b32.xlu0 %v89_v0, %s115_s10  ;;  %19 = vrot.lane.b32.xlu1 %v91_v1, %s116_s11  ;;  %v92_v3 = vld [vmem:[%s183_s0 + $0xa] sm:$0x1]   ;;  %s117_s16 = smov 96   ;;  %s118_s17 = smov 80   ;;  %v93_v4 = vld [vmem:[%s183_s0 + $0x9] sm:$0x1]  }
   0x3   :  { %v94_v5 = vld [vmem:[%s183_s0 + $0x8] sm:$0x1]   ;;  %v2_v6 = vld [vmem:[%s183_s0] sm:$0x1]   ;;  %s119_s24 = smov 72   ;;  %s120_s25 = smov 64  }
   0x4   :  { %4 = vst.msk [vmem:[#allocation0] sm:$0x1] %vm3_vm0, %v2_v6   ;;  %v95_v7 = vld [vmem:[%s183_s0 + $0x7] sm:$0x1]   ;;  %v96_v8 = vld [vmem:[%s183_s0 + $0x6] sm:$0x1]  }
   0x5   :  { %s121_s30 = smov 56   ;;  %s122_s2 = smov 48   ;;  %v97_v9 = vld [vmem:[%s183_s0 + $0x5] sm:$0x1]   ;;  %v98_v10 = vld [vmem:[%s183_s0 + $0x4] sm:$0x1]  }
   0x6   :  { %13 = vrot.lane.b32.xlu0 %v90_v2, %s117_s16  ;;  %25 = vrot.lane.b32.xlu1 %v92_v3, %s118_s17  ;;  %s123_s7 = smov 40   ;;  %s124_s8 = smov 32   ;;  %v99_v11 = vld [vmem:[%s183_s0 + $0x3] sm:$0x1]   ;;  %v100_v12 = vld [vmem:[%s183_s0 + $0x2] sm:$0x1]  }
   0x7   :  { %s125_s13 = smov 24   ;;  %s126_s14 = smov 16   ;;  %v101_v13 = vld [vmem:[%s183_s0 + $0x1] sm:$0x1]   ;;  %vm27_vm4 = vcmask 720512   ;;  %vm33_vm5 = vcmask 654912  }
   0x8   :  { %s127_s0 = smov 8   ;;  %vm39_vm6 = vcmask 589312   ;;  %vm45_vm7 = vcmask 523712   ;;  %vm51_vm8 = vcmask 458112   ;;  %vm57_vm9 = vcmask 392512  }
   0x9   :  { %vm63_vm10 = vcmask 326912   ;;  %vm69_vm11 = vcmask 261312   ;;  %vm75_vm12 = vcmask 195712   ;;  %vm81_vm13 = vcmask 130112  }
   0xa   :  { %31 = vrot.lane.b32.xlu0 %v93_v4, %s119_s24  ;;  %37 = vrot.lane.b32.xlu1 %v94_v5, %s120_s25 }
   0xe   :  { %43 = vrot.lane.b32.xlu0 %v95_v7, %s121_s30  ;;  %49 = vrot.lane.b32.xlu1 %v96_v8, %s122_s2 }
  0x12   :  { %55 = vrot.lane.b32.xlu0 %v97_v9, %s123_s7  ;;  %61 = vrot.lane.b32.xlu1 %v98_v10, %s124_s8 }
  0x16   :  { %67 = vrot.lane.b32.xlu0 %v99_v11, %s125_s13  ;;  %73 = vrot.lane.b32.xlu1 %v100_v12, %s126_s14 }
  0x1a   :  { %79 = vrot.lane.b32.xlu0 %v101_v13, %s127_s0 }
  0x74   :  { %v8_v14 = vpop.permute.xlu0 %7   ;;  %v20_v15 = vpop.permute.xlu1 %19  }
  0x75   :  { %10 = vst.msk [vmem:[#allocation0] sm:$0x1] %vm9_vm1, %v8_v14  }
  0x78   :  { %v14_v16 = vpop.permute.xlu0 %13   ;;  %v26_v17 = vpop.permute.xlu1 %25  }
  0x79   :  { %16 = vst.msk [vmem:[#allocation0] sm:$0x1] %vm15_vm2, %v14_v16  }
  0x7a   :  { %22 = vst.msk [vmem:[#allocation0] sm:$0x1] %vm21_vm3, %v20_v15  }
  0x7b   :  { %28 = vst.msk [vmem:[#allocation0] sm:$0x1] %vm27_vm4, %v26_v17  }
  0x7c   :  { %v32_v18 = vpop.permute.xlu0 %31   ;;  %v38_v19 = vpop.permute.xlu1 %37  }
  0x7d   :  { %34 = vst.msk [vmem:[#allocation0] sm:$0x1] %vm33_vm5, %v32_v18  }
  0x7e   :  { %40 = vst.msk [vmem:[#allocation0] sm:$0x1] %vm39_vm6, %v38_v19  }
  0x80   :  { %v44_v20 = vpop.permute.xlu0 %43   ;;  %v50_v21 = vpop.permute.xlu1 %49  }
  0x81   :  { %46 = vst.msk [vmem:[#allocation0] sm:$0x1] %vm45_vm7, %v44_v20  }
  0x82   :  { %52 = vst.msk [vmem:[#allocation0] sm:$0x1] %vm51_vm8, %v50_v21  }
  0x84   :  { %v56_v22 = vpop.permute.xlu0 %55   ;;  %v62_v23 = vpop.permute.xlu1 %61  }
  0x85   :  { %58 = vst.msk [vmem:[#allocation0] sm:$0x1] %vm57_vm9, %v56_v22  }
  0x86   :  { %64 = vst.msk [vmem:[#allocation0] sm:$0x1] %vm63_vm10, %v62_v23  }
  0x88   :  { %v68_v24 = vpop.permute.xlu0 %67   ;;  %v74_v25 = vpop.permute.xlu1 %73  }
  0x89   :  { %70 = vst.msk [vmem:[#allocation0] sm:$0x1] %vm69_vm11, %v68_v24  }
  0x8a   :  { %76 = vst.msk [vmem:[#allocation0] sm:$0x1] %vm75_vm12, %v74_v25  }
  0x8c   :  { %v80_v26 = vpop.permute.xlu0 %79  }
  0x8d   :  { %82 = vst.msk [vmem:[#allocation0] sm:$0x1] %vm81_vm13, %v80_v26  }
  0x94   :  { %v86_v27 = vld [vmem:[#allocation0] sm:$0x1] }
  0x95   :  { %88 = vst [vmem:[%s184_s1] sm:$0x1] %v86_v27 }

// kernel: extraction_conv2d.3
= control target key start
LH: loop header
LB: loop body
LE: loop exit
PB: predicated region body
PF: predicated region fallthrough
CT: control target
= control target key end

     0   :  { %s668_s12 = smov 0   ;;  %s737_s0 = inlined_call_operand.vmem [shape: bf16[2,16,64], index: 0, kind: input, shape index: {}]   ;;  %s738_s1 = inlined_call_operand.vmem [shape: bf16[3,64,112], index: 1, kind: input, shape index: {}]   ;;  %s739_s2 = inlined_call_operand.vmem [shape: f32[2,112], index: 2, kind: input, shape index: {}]   ;;  %s740_s3 = inlined_call_operand.vmem [shape: f32[2,14,112], index: 3, kind: output, shape index: {}]  }
   0x1 LB: > { %s507_s13 = sadd.s32 4294967295, %s644_s12   ;;  %p511_p0 = scmp.ge.s32.totalorder %s644_s12, 1  ;;  %s644_s12 = sphi %s668_s12, %s13_s12  }
   0x2   : > { %p137_p1 = scmp.lt.s32.totalorder %s644_s12, 3 }
   0x4   : > { %p138_p2 = pnand %p511_p0, %p137_p1 }
   0x5   : > { %v623_v0 = vld [vmem:[%s738_s1] sm:$0xff] (!%p138_p2)   ;;  %v646_v1 = vmov (!%p138_p2), 0.0   ;;  %v624_v2 = vld [vmem:[%s738_s1 + $0x8] sm:$0xff] (!%p138_p2)   ;;  %vm647_vm0 = vmmov (!%p138_p2), 0   ;;  %p161_p3 = scmp.lt.s32.totalorder (!%p138_p2), %s507_s13, 1  ;;  %v625_v4 = vld [vmem:[%s738_s1 + $0x10] sm:$0xff] (!%p138_p2)  }
   0x6   : > { %141 = sbr.rel (%p138_p2) target bundleno = 262 (0x106), region = 32  ;;  %583 = vmatprep.subr.bf16.mxu0 (!%p138_p2), %v646_v1  ;;  %571 = vmatprep.subr.bf16.mxu1 (!%p138_p2), %v646_v1  ;;  %v627_v3 = vld [vmem:[%s738_s1 + $0x20] sm:$0xff] (!%p138_p2)   ;;  %v632_v5 = vld [vmem:[%s738_s1 + $0x28] sm:$0xff] (!%p138_p2)   ;;  %v626_v6 = vld [vmem:[%s738_s1 + $0x18] sm:$0xff] (!%p138_p2)   ;;  %vm228_vm1 = vcmask (!%p138_p2), 523264   ;;  %vm448_vm3 = vcmask (!%p138_p2), 916480  }
   0x7   : > { %584 = vmatpush3.bf16.msra.mxu0 (!%p138_p2), %v623_v0  ;;  %591 = vmatprep.mubr.msk.bf16.mxu0 (!%p138_p2), %vm647_vm0, %v646_v1  ;;  %v634_v11 = vld [vmem:[%s738_s1 + $0x30] sm:$0xff] (!%p138_p2)   ;;  %v631_v15 = vld [vmem:[%s738_s1 + $0x40] sm:$0xff] (!%p138_p2)   ;;  %v636_v16 = vld [vmem:[%s738_s1 + $0x38] sm:$0xff] (!%p138_p2)   ;;  %vm450_vm5 = vcmask (!%p138_p2), 914432  }
   0x8   : > { %585 = vmatprep.subr.bf16.mxu0 (!%p138_p2), %v646_v1  ;;  %579 = vmatprep.mubr.msk.bf16.mxu1 (!%p138_p2), %vm647_vm0, %v646_v1  ;;  %v633_v19 = vld [vmem:[%s738_s1 + $0x48] sm:$0xff] (!%p138_p2)   ;;  %v635_v21 = vld [vmem:[%s738_s1 + $0x50] sm:$0xff] (!%p138_p2)   ;;  %v637_v23 = vld [vmem:[%s738_s1 + $0x58] sm:$0xff] (!%p138_p2)  }
   0x9   : > { %572 = vmatpush3.bf16.msra.mxu1 (!%p138_p2), %v627_v3  ;;  %v550_v30 = vld [vmem:[%s739_s2] ss:$0 sm:$0xff] (!%p138_p2)  ;;  %v551_v33 = vld [vmem:[%s739_s2 + $0x1] ss:$0 sm:$0xff] (!%p138_p2) }
   0xa   : > { %573 = vmatprep.subr.bf16.mxu1 (!%p138_p2), %v646_v1 }
   0xb   : > { %586 = vmatpush3.bf16.msra.mxu0 (!%p138_p2), %v624_v2 }
   0xc   : > { %587 = vmatprep.subr.bf16.mxu0 (!%p138_p2), %v646_v1 }
   0xd   : > { %s742_s13 = smov (!%p161_p3, %s507_s13), 1  ;;  %574 = vmatpush3.bf16.msra.mxu1 %v632_v5 }
   0xe   : > { %s554_s22 = sshll.u32 %s742_s13, 3  ;;  %575 = vmatprep.subr.bf16.mxu1 %v646_v1  ;;  %s555_s21 = sshll.u32 %s742_s13, 4 }
   0xf   : > { %s165_s27 = scalar_lea.vmem %s737_s0, %s554_s22  ;;  %588 = vmatpush3.bf16.msra.mxu0 %v625_v4  ;;  %s170_s24 = scalar_lea.vmem %s740_s3, %s555_s21 }
  0x10   : > { %v172_v7 = vld [vmem:[%s165_s27] sm:$0xf]  ;;  %v182_v8 = vld [vmem:[%s165_s27 + $0x4] sm:$0xf]  ;;  %589 = vmatprep.subr.bf16.mxu0 %v646_v1 }
  0x11   : > { %v173_v9 = vld [vmem:[%s165_s27 + $0x4] sm:$0x7]  ;;  %v524_v10 = vcombine.low %v172_v7, %v182_v8  ;;  %576 = vmatpush3.bf16.msra.mxu1 %v634_v11  ;;  %v344_v20 = vld [vmem:[%s165_s27] sm:$0xe] }
  0x12   : > { %v530_v13 = vcombine.low %v172_v7, %v173_v9  ;;  %577 = vmatprep.subr.bf16.mxu1 %v646_v1  ;;  %v544_v22 = vcombine.low %v344_v20, %v182_v8 }
  0x13   : > { %v200_v12 = vshll.u32 %v524_v10, 16  ;;  %v198_v14 = vshrl.u32 %v524_v10, 16  ;;  %590 = vmatpush3.bf16.msra.mxu0 %v626_v6 }
  0x14   : > { %595 = vmatprep.subr.bf16.mxu0 %v646_v1  ;;  %v357_v24 = vrot.slane %v544_v22, 1 }
  0x15   : > { %v202_v17 = vrot.slane %v200_v12, 1  ;;  %578 = vmatpush3.bf16.msra.mxu1 %v636_v16 }
  0x16   : > { %592 = vmatmul.mubr.msk.bf16.vlgmr.msra.gmra.mrb[0].mxu0 %vm228_vm1, %v530_v13 }
  0x17   : > { %v203_v18 = vor.u32 %v202_v17, %v198_v14  ;;  %596 = vmatpush3.bf16.msra.mxu0 %v631_v15  ;;  %603 = vmatprep.mubr.msk.bf16.mxu0 %vm647_vm0, %v646_v1 }
  0x18   : > { %597 = vmatprep.subr.bf16.mxu0 %v646_v1 }
  0x19   : > { %580 = vmatmul.mubr.msk.bf16.vlgmr.msra.gmra.mrb[0].mxu1 %vm228_vm1, %v203_v18 }
  0x1b   : > { %598 = vmatpush3.bf16.msra.mxu0 %v633_v19 }
  0x1c   : > { %599 = vmatprep.subr.bf16.mxu0 %v646_v1 }
  0x1f   : > { %600 = vmatpush3.bf16.msra.mxu0 %v635_v21 }
  0x20   : > { %601 = vmatprep.subr.bf16.mxu0 %v646_v1 }
  0x23   : > { %602 = vmatpush3.bf16.msra.mxu0 %v637_v23 }
  0x26   : > { %604 = vmatmul.mubr.msk.bf16.vlgmr.msra.gmra.mrb[0].mxu0 %vm228_vm1, %v357_v24 }
  0xec   : > { %v266_v25 = vpop.f32.mrb[0].mxu1 }
  0xed   : > { %v581_v26 = vpop.f32.mrb[1].mxu1 }
  0xee   : > { %v269_v27 = vpop.f32.mrb[2].mxu1 }
  0xef   : > { %v582_v28 = vpop.f32.mrb[3].mxu1 }
  0xf9   : > { %v419_v29 = vpop.f32.mrb[0].mxu0 }
  0xfa   : > { %v607_v31 = vadd.f32 %v419_v29, %v266_v25  ;;  %v605_v32 = vpop.f32.mrb[1].mxu0 }
  0xfb   : > { %v422_v34 = vpop.f32.mrb[2].mxu0 }
  0xfc   : > { %v434_v35 = vmul.f32 %v607_v31, %v550_v30  ;;  %v608_v36 = vadd.f32 %v422_v34, %v269_v27  ;;  %v606_v37 = vpop.f32.mrb[3].mxu0 }
  0xfe   : > { %v440_v38 = vadd.f32 %v551_v33, %v434_v35  ;;  %v435_v39 = vmul.f32 %v608_v36, %v550_v30 }
 0x100   : > { %vm442_vm2 = vcmp.ge.f32.partialorder %v440_v38, 0.0  ;;  %v444_v40 = vmul.f32 0.1, %v440_v38  ;;  %v441_v41 = vadd.f32 %v551_v33, %v435_v39 }
 0x102   : > { %v446_v42 = vsel %vm442_vm2, %v440_v38, %v444_v40  ;;  %vm443_vm4 = vcmp.ge.f32.partialorder %v441_v41, 0.0  ;;  %v445_v43 = vmul.f32 0.1, %v441_v41 }
 0x103   : > { %449 = vst.msk [vmem:[%s170_s24] sm:$0xff] %vm448_vm3, %v446_v42 }
 0x104   : > { %v447_v44 = vsel %vm443_vm4, %v441_v41, %v445_v43 }
 0x105   : > { %451 = vst.msk [vmem:[%s170_s24 + $0x8] sm:$0x3f] %vm450_vm5, %v447_v44 }
 0x106 PF: > { %s13_s12 = sadd.s32 1, %s644_s12  }
 0x107   : > { %p10_p4 = scmp.ge.s32.totalorder %s13_s12, 4  }
 0x109   :  { %12 = sbr.rel (!%p10_p4) target bundleno = 1 (0x1), region = 64 }

</bundles_post_ra>
